<compile_context>
chip_gen: v5e
topology: v5e:2x2
jax: 0.10.0
libtpu: 0.0.40
codegen_flags: <defaults>
</compile_context>

<pallas_src>
import functools

import jax
import jax.numpy as jnp
from jax import lax
from jax.experimental import pallas as pl
from jax.experimental.pallas import tpu as pltpu  # noqa: F401  (TPU backend assumed)


# ----------------------------- fused Pallas kernel ---------------------------

def _make_fused_kernel(B, N, E, stage):
    f32, bf16 = jnp.float32, jnp.bfloat16

    def dense(h, w_ref, b_ref):
        # (B*N, E) @ (E, E): bf16 operands (MXU single pass), f32 accumulation.
        return jnp.dot(h.astype(bf16), w_ref[...], preferred_element_type=f32) + b_ref[...]

    def kernel(*refs):
        x_ref, hw1, hb1, hw2, hb2, hw3, hb3 = refs[:7]
        idx = 7
        if stage > 0:
            wa_all, wb_all, bm_all = refs[7:10]
            idx = 10
        tw1, tb1, tw2, tb2, tw3, tb3, o_ref = refs[idx:idx + 7]

        # -------- encoder: Linear(1->E) + ReLU, then 2x (Linear(E->E) + ReLU) --------
        x = x_ref[...]                                              # (B*N, 1) f32
        h = jnp.maximum(x * hw1[...] + hb1[...], 0.0)               # (B*N, E), VPU broadcast
        h = jnp.maximum(dense(h, hw2, hb2), 0.0)
        h = jnp.maximum(dense(h, hw3, hb3), 0.0)

        # -------- middle blocks: per-batch norm/gram (batched dots), Linear(2E->E) ----
        for s in range(stage):
            wa = wa_all[s]                                          # (E, E) bf16
            wb = wb_all[s]                                          # (E, E) bf16
            bm = bm_all[s]                                          # (1, E) f32
            h3 = h.reshape(B, N, E)                                 # leading-dim split, no copy
            # torch: x.norm(dim=1, keepdim=True) -> per-column L2 norm over sequence axis
            nrm = jnp.sqrt(jnp.sum(h3 * h3, axis=1, keepdims=True))            # (B, 1, E)
            xn = h3 * pl.reciprocal(nrm + 1e-6, approx=True)                   # (B, N, E)
            # gram = xn^T @ xn (contract sequence axis), then m = xn @ gram, batched over B
            gram = lax.dot_general(xn, xn, (((1,), (1,)), ((0,), (0,))),
                                   preferred_element_type=f32)                 # (B, E, E)
            m3 = lax.dot_general(xn, gram, (((2,), (1,)), ((0,), (0,))),
                                 preferred_element_type=f32)                   # (B, N, E)
            m = m3.reshape(B * N, E)
            # Linear(2E->E) on cat([h, m], -1) == h @ Wa + m @ Wb + b   (split weights)
            h = jnp.maximum(
                jnp.dot(h.astype(bf16), wa, preferred_element_type=f32)
                + jnp.dot(m.astype(bf16), wb, preferred_element_type=f32)
                + bm, 0.0)

        # -------- decoder: 2x (Linear(E->E) + ReLU), then Linear(E->1) ---------------
        t = jnp.maximum(dense(h, tw1, tb1), 0.0)
        t = jnp.maximum(dense(t, tw2, tb2), 0.0)
        y = jnp.sum(t * tw3[...], axis=-1, keepdims=True) + tb3[...]           # (B*N, 1)
        o_ref[...] = y

    return kernel


# ----------------------------- one-time weight packing ------------------------

def pack_params(params):
    """Pre-transpose / split / cast weights once (not per forward call)."""
    bf16, f32 = jnp.bfloat16, jnp.float32
    (w1, b1), (w2, b2), (w3, b3) = params["encoder"]
    E = w1.shape[0]
    head = (w1.reshape(1, E).astype(f32), b1.reshape(1, E).astype(f32),
            w2.T.astype(bf16), b2.reshape(1, E).astype(f32),
            w3.T.astype(bf16), b3.reshape(1, E).astype(f32))
    blocks = None
    if params["blocks"]:
        wa = jnp.stack([w[:, :E].T for (w, _) in params["blocks"]]).astype(bf16)
        wb = jnp.stack([w[:, E:].T for (w, _) in params["blocks"]]).astype(bf16)
        bm = jnp.stack([b.reshape(1, E) for (_, b) in params["blocks"]]).astype(f32)
        blocks = (wa, wb, bm)
    (d1, c1), (d2, c2), (d3, c3) = params["decoder"]
    tail = (d1.T.astype(bf16), c1.reshape(1, E).astype(f32),
            d2.T.astype(bf16), c2.reshape(1, E).astype(f32),
            d3.reshape(1, E).astype(f32), c3.reshape(1, 1).astype(f32))
    return {"head": head, "blocks": blocks, "tail": tail}


# ----------------------------- forward wrapper --------------------------------

@functools.partial(jax.jit, static_argnames=("stage",))
def my_model_forward(x, packed, stage=0):
    B, N = x.shape
    head, blocks, tail = packed["head"], packed["blocks"], packed["tail"]
    E = head[0].shape[1]

    args = [x.reshape(B * N, 1).astype(jnp.float32)]
    args += list(head)
    if stage > 0:
        wa, wb, bm = blocks
        args += [wa[:stage], wb[:stage], bm[:stage]]
    args += list(tail)

    # Advisory cost estimate for XLA's scheduler.
    n_dense = 4 + 2 * stage                                   # (B*N,E)@(E,E) dense layers
    flops = (2 * (B * N) * E * E * n_dense
             + stage * B * (2 * E * N * E + 2 * N * E * E)    # gram + m per batch
             + 2 * (B * N) * E)                               # final E->1
    transcendentals = 2 * stage * B * E
    bytes_accessed = sum(int(a.size) * a.dtype.itemsize for a in args) + B * N * 4

    out = pl.pallas_call(
        _make_fused_kernel(B, N, E, stage),
        out_shape=jax.ShapeDtypeStruct((B * N, 1), jnp.float32),
        cost_estimate=pl.CostEstimate(flops=flops,
                                      transcendentals=transcendentals,
                                      bytes_accessed=bytes_accessed),
    )(*args)
    return out.reshape(B, N)                       # matches torch's x.view(x.size(0), -1)


# ----------------------------- parameters -------------------------------------

def _linear_init(key, in_f, out_f):
    # PyTorch nn.Linear default: U(-1/sqrt(fan_in), 1/sqrt(fan_in))
    kw, kb = jax.random.split(key)
    bound = 1.0 / (in_f ** 0.5)
    W = jax.random.uniform(kw, (out_f, in_f), jnp.float32, -bound, bound)
    b = jax.random.uniform(kb, (out_f,), jnp.float32, -bound, bound)
    return W, b


def init_params(key, dim=128, deepth=2):
    keys = jax.random.split(key, 6 + deepth)
    enc = (_linear_init(keys[0], 1, dim),
           _linear_init(keys[1], dim, dim),
           _linear_init(keys[2], dim, dim))
    blocks = tuple(_linear_init(keys[3 + i], 2 * dim, dim) for i in range(deepth))
    dec = (_linear_init(keys[3 + deepth], dim, dim),
           _linear_init(keys[4 + deepth], dim, dim),
           _linear_init(keys[5 + deepth], dim, 1))
    return {"encoder": enc, "blocks": blocks, "decoder": dec}


# ----------------------------- pure-JAX reference -----------------------------

def reference_forward(x, params, stage=0):
    (w1, b1), (w2, b2), (w3, b3) = params["encoder"]
    B, N = x.shape
    h = x.reshape(B, N, 1)
    h = jnp.maximum(h @ w1.T + b1, 0.0)
    h = jnp.maximum(h @ w2.T + b2, 0.0)
    h = jnp.maximum(h @ w3.T + b3, 0.0)
    for s in range(stage):
        w, b = params["blocks"][s]
        nrm = jnp.linalg.norm(h, axis=1, keepdims=True)
        xn = h / (nrm + 1e-6)
        mat = jnp.einsum("bne,bnf->bef", xn, xn)
        mat = jnp.einsum("bne,bef->bnf", xn, mat)
        cat = jnp.concatenate([h, mat], axis=2)
        h = jnp.maximum(cat @ w.T + b, 0.0)
    (w1, b1), (w2, b2), (w3, b3) = params["decoder"]
    h = jnp.maximum(h @ w1.T + b1, 0.0)
    h = jnp.maximum(h @ w2.T + b2, 0.0)
    h = h @ w3.T + b3
    return h.reshape(B, -1)


# ----------------------------- main --------------------------------------------

if __name__ == "__main__":
    B, N, DIM = 2, 8, 128      # small shapes; DIM matches the module default dim=128
    DEEPTH = 2                 # number of BadTransformerBlockMiddle blocks instantiated
    STAGE = 2                  # run both middle blocks

    key = jax.random.PRNGKey(0)
    kp, kx = jax.random.split(key)
    params = init_params(kp, dim=DIM, deepth=DEEPTH)
    packed = pack_params(params)               # one-time weight prep (transpose/split/bf16)
    x = jax.random.normal(kx, (B, N), dtype=jnp.float32)

    out = my_model_forward(x, packed, stage=STAGE)
    out = jax.block_until_ready(out)

    ref = reference_forward(x, params, stage=STAGE)
    err = float(jnp.max(jnp.abs(out - ref)))
    # Kernel uses bf16 MXU operands with f32 accumulation (TPU-native single pass) vs a
    # plain-f32 XLA reference, so allow bf16-level tolerance.
    if not (err < 2e-2):
        raise AssertionError(f"Pallas result mismatch: max abs err = {err}")
    print("KERNEL_OK")
</pallas_src>

<mosaic_0001>
module attributes {stable_mosaic.version = 11 : i64} {
  func.func @kernel(%arg0: memref<16x1xf32, #tpu.memory_space<vmem>>, %arg1: memref<1x128xf32, #tpu.memory_space<vmem>>, %arg2: memref<1x128xf32, #tpu.memory_space<vmem>>, %arg3: memref<128x128xbf16, #tpu.memory_space<vmem>>, %arg4: memref<1x128xf32, #tpu.memory_space<vmem>>, %arg5: memref<128x128xbf16, #tpu.memory_space<vmem>>, %arg6: memref<1x128xf32, #tpu.memory_space<vmem>>, %arg7: memref<2x128x128xbf16, #tpu.memory_space<vmem>>, %arg8: memref<2x128x128xbf16, #tpu.memory_space<vmem>>, %arg9: memref<2x1x128xf32, #tpu.memory_space<vmem>>, %arg10: memref<128x128xbf16, #tpu.memory_space<vmem>>, %arg11: memref<1x128xf32, #tpu.memory_space<vmem>>, %arg12: memref<128x128xbf16, #tpu.memory_space<vmem>>, %arg13: memref<1x128xf32, #tpu.memory_space<vmem>>, %arg14: memref<1x128xf32, #tpu.memory_space<vmem>>, %arg15: memref<1x1xf32, #tpu.memory_space<vmem>>, %arg16: memref<16x1xf32, #tpu.memory_space<vmem>>) attributes {dimension_semantics = [], scalar_prefetch = 0 : i64, scratch_operands = 0 : i64, tpu.core_type = #tpu.core_type<tc>} {
    %c0 = arith.constant 0 : index
    %c0_0 = arith.constant 0 : index
    %0 = vector.load %arg0[%c0, %c0_0] : memref<16x1xf32, #tpu.memory_space<vmem>>, vector<16x1xf32>
    %c0_1 = arith.constant 0 : index
    %c0_2 = arith.constant 0 : index
    %1 = vector.load %arg1[%c0_1, %c0_2] : memref<1x128xf32, #tpu.memory_space<vmem>>, vector<1x128xf32>
    %2 = vector.broadcast %0 : vector<16x1xf32> to vector<16x128xf32>
    %3 = vector.broadcast %1 : vector<1x128xf32> to vector<16x128xf32>
    %4 = arith.mulf %2, %3 : vector<16x128xf32>
    %c0_3 = arith.constant 0 : index
    %c0_4 = arith.constant 0 : index
    %5 = vector.load %arg2[%c0_3, %c0_4] : memref<1x128xf32, #tpu.memory_space<vmem>>, vector<1x128xf32>
    %6 = vector.broadcast %5 : vector<1x128xf32> to vector<16x128xf32>
    %7 = arith.addf %4, %6 : vector<16x128xf32>
    %cst = arith.constant 0.000000e+00 : f32
    %8 = vector.broadcast %cst : f32 to vector<16x128xf32>
    %9 = arith.maximumf %7, %8 : vector<16x128xf32>
    %10 = arith.truncf %9 : vector<16x128xf32> to vector<16x128xbf16>
    %c0_5 = arith.constant 0 : index
    %c0_6 = arith.constant 0 : index
    %11 = vector.load %arg3[%c0_5, %c0_6] : memref<128x128xbf16, #tpu.memory_space<vmem>>, vector<128x128xbf16>
    %cst_7 = arith.constant dense<0.000000e+00> : vector<16x128xf32>
    %12 = tpu.matmul %10, %11, %cst_7 {dimension_numbers = #tpu.dot_dimension_numbers<[1], [0], [0], [1], [0, 0, 1, 1], [], []>} : vector<16x128xbf16>, vector<128x128xbf16>, vector<16x128xf32> -> vector<16x128xf32>
    %c0_8 = arith.constant 0 : index
    %c0_9 = arith.constant 0 : index
    %13 = vector.load %arg4[%c0_8, %c0_9] : memref<1x128xf32, #tpu.memory_space<vmem>>, vector<1x128xf32>
    %14 = vector.broadcast %13 : vector<1x128xf32> to vector<16x128xf32>
    %15 = arith.addf %12, %14 : vector<16x128xf32>
    %cst_10 = arith.constant 0.000000e+00 : f32
    %16 = vector.broadcast %cst_10 : f32 to vector<16x128xf32>
    %17 = arith.maximumf %15, %16 : vector<16x128xf32>
    %18 = arith.truncf %17 : vector<16x128xf32> to vector<16x128xbf16>
    %c0_11 = arith.constant 0 : index
    %c0_12 = arith.constant 0 : index
    %19 = vector.load %arg5[%c0_11, %c0_12] : memref<128x128xbf16, #tpu.memory_space<vmem>>, vector<128x128xbf16>
    %cst_13 = arith.constant dense<0.000000e+00> : vector<16x128xf32>
    %20 = tpu.matmul %18, %19, %cst_13 {dimension_numbers = #tpu.dot_dimension_numbers<[1], [0], [0], [1], [0, 0, 1, 1], [], []>} : vector<16x128xbf16>, vector<128x128xbf16>, vector<16x128xf32> -> vector<16x128xf32>
    %c0_14 = arith.constant 0 : index
    %c0_15 = arith.constant 0 : index
    %21 = vector.load %arg6[%c0_14, %c0_15] : memref<1x128xf32, #tpu.memory_space<vmem>>, vector<1x128xf32>
    %22 = vector.broadcast %21 : vector<1x128xf32> to vector<16x128xf32>
    %23 = arith.addf %20, %22 : vector<16x128xf32>
    %cst_16 = arith.constant 0.000000e+00 : f32
    %24 = vector.broadcast %cst_16 : f32 to vector<16x128xf32>
    %25 = arith.maximumf %23, %24 : vector<16x128xf32>
    %c0_17 = arith.constant 0 : index
    %c0_18 = arith.constant 0 : index
    %c0_19 = arith.constant 0 : index
    %26 = vector.load %arg7[%c0_17, %c0_18, %c0_19] : memref<2x128x128xbf16, #tpu.memory_space<vmem>>, vector<1x128x128xbf16>
    %27 = vector.shape_cast %26 : vector<1x128x128xbf16> to vector<128x128xbf16>
    %c0_20 = arith.constant 0 : index
    %c0_21 = arith.constant 0 : index
    %c0_22 = arith.constant 0 : index
    %28 = vector.load %arg8[%c0_20, %c0_21, %c0_22] : memref<2x128x128xbf16, #tpu.memory_space<vmem>>, vector<1x128x128xbf16>
    %29 = vector.shape_cast %28 : vector<1x128x128xbf16> to vector<128x128xbf16>
    %c0_23 = arith.constant 0 : index
    %c0_24 = arith.constant 0 : index
    %c0_25 = arith.constant 0 : index
    %30 = vector.load %arg9[%c0_23, %c0_24, %c0_25] : memref<2x1x128xf32, #tpu.memory_space<vmem>>, vector<1x1x128xf32>
    %31 = vector.shape_cast %30 : vector<1x1x128xf32> to vector<1x128xf32>
    %32 = vector.shape_cast %25 : vector<16x128xf32> to vector<2x8x128xf32>
    %33 = arith.mulf %32, %32 : vector<2x8x128xf32>
    %cst_26 = arith.constant dense<0.000000e+00> : vector<2x128xf32>
    %34 = vector.multi_reduction <add>, %33, %cst_26 [1] : vector<2x8x128xf32> to vector<2x128xf32>
    %35 = vector.shape_cast %34 : vector<2x128xf32> to vector<2x1x128xf32>
    %36 = math.sqrt %35 : vector<2x1x128xf32>
    %cst_27 = arith.constant 9.99999997E-7 : f32
    %37 = vector.broadcast %cst_27 : f32 to vector<2x1x128xf32>
    %38 = arith.addf %36, %37 : vector<2x1x128xf32>
    %39 = tpu.reciprocal %38 {approx = true} : vector<2x1x128xf32> -> vector<2x1x128xf32>
    %40 = vector.broadcast %39 : vector<2x1x128xf32> to vector<2x8x128xf32>
    %41 = arith.mulf %32, %40 : vector<2x8x128xf32>
    %cst_28 = arith.constant dense<0.000000e+00> : vector<2x128x128xf32>
    %42 = tpu.matmul %41, %41, %cst_28 {dimension_numbers = #tpu.dot_dimension_numbers<[1], [1], [2], [2], [0, 0, 0, 2, 1, 2], [0], [0]>} : vector<2x8x128xf32>, vector<2x8x128xf32>, vector<2x128x128xf32> -> vector<2x128x128xf32>
    %cst_29 = arith.constant dense<0.000000e+00> : vector<2x8x128xf32>
    %43 = tpu.matmul %41, %42, %cst_29 {dimension_numbers = #tpu.dot_dimension_numbers<[2], [1], [1], [2], [0, 0, 0, 1, 1, 2], [0], [0]>} : vector<2x8x128xf32>, vector<2x128x128xf32>, vector<2x8x128xf32> -> vector<2x8x128xf32>
    %44 = vector.shape_cast %43 : vector<2x8x128xf32> to vector<16x128xf32>
    %45 = arith.truncf %25 : vector<16x128xf32> to vector<16x128xbf16>
    %cst_30 = arith.constant dense<0.000000e+00> : vector<16x128xf32>
    %46 = tpu.matmul %45, %27, %cst_30 {dimension_numbers = #tpu.dot_dimension_numbers<[1], [0], [0], [1], [0, 0, 1, 1], [], []>} : vector<16x128xbf16>, vector<128x128xbf16>, vector<16x128xf32> -> vector<16x128xf32>
    %47 = arith.truncf %44 : vector<16x128xf32> to vector<16x128xbf16>
    %cst_31 = arith.constant dense<0.000000e+00> : vector<16x128xf32>
    %48 = tpu.matmul %47, %29, %cst_31 {dimension_numbers = #tpu.dot_dimension_numbers<[1], [0], [0], [1], [0, 0, 1, 1], [], []>} : vector<16x128xbf16>, vector<128x128xbf16>, vector<16x128xf32> -> vector<16x128xf32>
    %49 = arith.addf %46, %48 : vector<16x128xf32>
    %50 = vector.broadcast %31 : vector<1x128xf32> to vector<16x128xf32>
    %51 = arith.addf %49, %50 : vector<16x128xf32>
    %cst_32 = arith.constant 0.000000e+00 : f32
    %52 = vector.broadcast %cst_32 : f32 to vector<16x128xf32>
    %53 = arith.maximumf %51, %52 : vector<16x128xf32>
    %c1 = arith.constant 1 : index
    %c0_33 = arith.constant 0 : index
    %c0_34 = arith.constant 0 : index
    %54 = vector.load %arg7[%c1, %c0_33, %c0_34] : memref<2x128x128xbf16, #tpu.memory_space<vmem>>, vector<1x128x128xbf16>
    %55 = vector.shape_cast %54 : vector<1x128x128xbf16> to vector<128x128xbf16>
    %c1_35 = arith.constant 1 : index
    %c0_36 = arith.constant 0 : index
    %c0_37 = arith.constant 0 : index
    %56 = vector.load %arg8[%c1_35, %c0_36, %c0_37] : memref<2x128x128xbf16, #tpu.memory_space<vmem>>, vector<1x128x128xbf16>
    %57 = vector.shape_cast %56 : vector<1x128x128xbf16> to vector<128x128xbf16>
    %c1_38 = arith.constant 1 : index
    %c0_39 = arith.constant 0 : index
    %c0_40 = arith.constant 0 : index
    %58 = vector.load %arg9[%c1_38, %c0_39, %c0_40] : memref<2x1x128xf32, #tpu.memory_space<vmem>>, vector<1x1x128xf32>
    %59 = vector.shape_cast %58 : vector<1x1x128xf32> to vector<1x128xf32>
    %60 = vector.shape_cast %53 : vector<16x128xf32> to vector<2x8x128xf32>
    %61 = arith.mulf %60, %60 : vector<2x8x128xf32>
    %cst_41 = arith.constant dense<0.000000e+00> : vector<2x128xf32>
    %62 = vector.multi_reduction <add>, %61, %cst_41 [1] : vector<2x8x128xf32> to vector<2x128xf32>
    %63 = vector.shape_cast %62 : vector<2x128xf32> to vector<2x1x128xf32>
    %64 = math.sqrt %63 : vector<2x1x128xf32>
    %cst_42 = arith.constant 9.99999997E-7 : f32
    %65 = vector.broadcast %cst_42 : f32 to vector<2x1x128xf32>
    %66 = arith.addf %64, %65 : vector<2x1x128xf32>
    %67 = tpu.reciprocal %66 {approx = true} : vector<2x1x128xf32> -> vector<2x1x128xf32>
    %68 = vector.broadcast %67 : vector<2x1x128xf32> to vector<2x8x128xf32>
    %69 = arith.mulf %60, %68 : vector<2x8x128xf32>
    %cst_43 = arith.constant dense<0.000000e+00> : vector<2x128x128xf32>
    %70 = tpu.matmul %69, %69, %cst_43 {dimension_numbers = #tpu.dot_dimension_numbers<[1], [1], [2], [2], [0, 0, 0, 2, 1, 2], [0], [0]>} : vector<2x8x128xf32>, vector<2x8x128xf32>, vector<2x128x128xf32> -> vector<2x128x128xf32>
    %cst_44 = arith.constant dense<0.000000e+00> : vector<2x8x128xf32>
    %71 = tpu.matmul %69, %70, %cst_44 {dimension_numbers = #tpu.dot_dimension_numbers<[2], [1], [1], [2], [0, 0, 0, 1, 1, 2], [0], [0]>} : vector<2x8x128xf32>, vector<2x128x128xf32>, vector<2x8x128xf32> -> vector<2x8x128xf32>
    %72 = vector.shape_cast %71 : vector<2x8x128xf32> to vector<16x128xf32>
    %73 = arith.truncf %53 : vector<16x128xf32> to vector<16x128xbf16>
    %cst_45 = arith.constant dense<0.000000e+00> : vector<16x128xf32>
    %74 = tpu.matmul %73, %55, %cst_45 {dimension_numbers = #tpu.dot_dimension_numbers<[1], [0], [0], [1], [0, 0, 1, 1], [], []>} : vector<16x128xbf16>, vector<128x128xbf16>, vector<16x128xf32> -> vector<16x128xf32>
    %75 = arith.truncf %72 : vector<16x128xf32> to vector<16x128xbf16>
    %cst_46 = arith.constant dense<0.000000e+00> : vector<16x128xf32>
    %76 = tpu.matmul %75, %57, %cst_46 {dimension_numbers = #tpu.dot_dimension_numbers<[1], [0], [0], [1], [0, 0, 1, 1], [], []>} : vector<16x128xbf16>, vector<128x128xbf16>, vector<16x128xf32> -> vector<16x128xf32>
    %77 = arith.addf %74, %76 : vector<16x128xf32>
    %78 = vector.broadcast %59 : vector<1x128xf32> to vector<16x128xf32>
    %79 = arith.addf %77, %78 : vector<16x128xf32>
    %cst_47 = arith.constant 0.000000e+00 : f32
    %80 = vector.broadcast %cst_47 : f32 to vector<16x128xf32>
    %81 = arith.maximumf %79, %80 : vector<16x128xf32>
    %82 = arith.truncf %81 : vector<16x128xf32> to vector<16x128xbf16>
    %c0_48 = arith.constant 0 : index
    %c0_49 = arith.constant 0 : index
    %83 = vector.load %arg10[%c0_48, %c0_49] : memref<128x128xbf16, #tpu.memory_space<vmem>>, vector<128x128xbf16>
    %cst_50 = arith.constant dense<0.000000e+00> : vector<16x128xf32>
    %84 = tpu.matmul %82, %83, %cst_50 {dimension_numbers = #tpu.dot_dimension_numbers<[1], [0], [0], [1], [0, 0, 1, 1], [], []>} : vector<16x128xbf16>, vector<128x128xbf16>, vector<16x128xf32> -> vector<16x128xf32>
    %c0_51 = arith.constant 0 : index
    %c0_52 = arith.constant 0 : index
    %85 = vector.load %arg11[%c0_51, %c0_52] : memref<1x128xf32, #tpu.memory_space<vmem>>, vector<1x128xf32>
    %86 = vector.broadcast %85 : vector<1x128xf32> to vector<16x128xf32>
    %87 = arith.addf %84, %86 : vector<16x128xf32>
    %cst_53 = arith.constant 0.000000e+00 : f32
    %88 = vector.broadcast %cst_53 : f32 to vector<16x128xf32>
    %89 = arith.maximumf %87, %88 : vector<16x128xf32>
    %90 = arith.truncf %89 : vector<16x128xf32> to vector<16x128xbf16>
    %c0_54 = arith.constant 0 : index
    %c0_55 = arith.constant 0 : index
    %91 = vector.load %arg12[%c0_54, %c0_55] : memref<128x128xbf16, #tpu.memory_space<vmem>>, vector<128x128xbf16>
    %cst_56 = arith.constant dense<0.000000e+00> : vector<16x128xf32>
    %92 = tpu.matmul %90, %91, %cst_56 {dimension_numbers = #tpu.dot_dimension_numbers<[1], [0], [0], [1], [0, 0, 1, 1], [], []>} : vector<16x128xbf16>, vector<128x128xbf16>, vector<16x128xf32> -> vector<16x128xf32>
    %c0_57 = arith.constant 0 : index
    %c0_58 = arith.constant 0 : index
    %93 = vector.load %arg13[%c0_57, %c0_58] : memref<1x128xf32, #tpu.memory_space<vmem>>, vector<1x128xf32>
    %94 = vector.broadcast %93 : vector<1x128xf32> to vector<16x128xf32>
    %95 = arith.addf %92, %94 : vector<16x128xf32>
    %cst_59 = arith.constant 0.000000e+00 : f32
    %96 = vector.broadcast %cst_59 : f32 to vector<16x128xf32>
    %97 = arith.maximumf %95, %96 : vector<16x128xf32>
    %c0_60 = arith.constant 0 : index
    %c0_61 = arith.constant 0 : index
    %98 = vector.load %arg14[%c0_60, %c0_61] : memref<1x128xf32, #tpu.memory_space<vmem>>, vector<1x128xf32>
    %99 = vector.broadcast %98 : vector<1x128xf32> to vector<16x128xf32>
    %100 = arith.mulf %97, %99 : vector<16x128xf32>
    %cst_62 = arith.constant dense<0.000000e+00> : vector<16xf32>
    %101 = vector.multi_reduction <add>, %100, %cst_62 [1] : vector<16x128xf32> to vector<16xf32>
    %102 = vector.shape_cast %101 : vector<16xf32> to vector<16x1xf32>
    %c0_63 = arith.constant 0 : index
    %c0_64 = arith.constant 0 : index
    %103 = vector.load %arg15[%c0_63, %c0_64] : memref<1x1xf32, #tpu.memory_space<vmem>>, vector<1x1xf32>
    %104 = vector.broadcast %103 : vector<1x1xf32> to vector<16x1xf32>
    %105 = arith.addf %102, %104 : vector<16x1xf32>
    %c0_65 = arith.constant 0 : index
    %c0_66 = arith.constant 0 : index
    %106 = vector.load %arg16[%c0_65, %c0_66] : memref<16x1xf32, #tpu.memory_space<vmem>>, vector<16x1xf32>
    tpu.vector_store %arg16[%c0_65, %c0_66], %105 {strides = array<i32>} : memref<16x1xf32, #tpu.memory_space<vmem>>, vector<16x1xf32>,
    return
  }
}

</mosaic_0001>

<bundles_post_ra>
// kernel: my_model_forward.1
= control target key start
LH: loop header
LB: loop body
LE: loop exit
PB: predicated region body
PF: predicated region fallthrough
CT: control target
= control target key end

     0   :  { %s2492_s0 = inlined_call_operand.vmem [shape: f32[16,1], index: 0, kind: input, shape index: {}]   ;;  %s2493_s1 = inlined_call_operand.vmem [shape: f32[1,128], index: 1, kind: input, shape index: {}]   ;;  %s2494_s2 = inlined_call_operand.vmem [shape: f32[1,128], index: 2, kind: input, shape index: {}]   ;;  %s2495_s3 = inlined_call_operand.hbm [shape: bf16[128,128], index: 3, kind: input, shape index: {}]   ;;  %s2496_s4 = inlined_call_operand.vmem [shape: f32[1,128], index: 4, kind: input, shape index: {}]   ;;  %s2497_s5 = inlined_call_operand.hbm [shape: bf16[128,128], index: 5, kind: input, shape index: {}]   ;;  %s2498_s6 = inlined_call_operand.vmem [shape: f32[1,128], index: 6, kind: input, shape index: {}]   ;;  %s2499_s7 = inlined_call_operand.hbm [shape: bf16[2,128,128], index: 7, kind: input, shape index: {}]   ;;  %s2500_s8 = inlined_call_operand.hbm [shape: bf16[2,128,128], index: 8, kind: input, shape index: {}]   ;;  %s2501_s9 = inlined_call_operand.vmem [shape: f32[2,1,128], index: 9, kind: input, shape index: {}]   ;;  %s2502_s10 = inlined_call_operand.hbm [shape: bf16[128,128], index: 10, kind: input, shape index: {}]   ;;  %s2503_s11 = inlined_call_operand.vmem [shape: f32[1,128], index: 11, kind: input, shape index: {}]   ;;  %s2504_s12 = inlined_call_operand.hbm [shape: bf16[128,128], index: 12, kind: input, shape index: {}]   ;;  %s2505_s13 = inlined_call_operand.vmem [shape: f32[1,128], index: 13, kind: input, shape index: {}]   ;;  %s2506_s14 = inlined_call_operand.vmem [shape: f32[1,128], index: 14, kind: input, shape index: {}]   ;;  %s2507_s15 = inlined_call_operand.<no memory space> [shape: f32[1,1], index: 15, kind: input, shape index: {}]   ;;  %s2508_s16 = inlined_call_operand.vmem [shape: f32[16,1], index: 16, kind: output, shape index: {}]  }
   0x1   :  { %2510 = sst [smem:[#allocation17_spill]] %s2492_s0  ;;  %v21_v0 = vstv %s2507_s15 }
   0x2   :  { %22 = vst [vmem:[#allocation2] sm:$0x1] %v21_v0 }
   0x3   :  { %23 = vsyncpa [#allocation4], 0 }
   0x4   :  { %24 = vsyncpa [#allocation6], 0 }
   0x5   :  { %25 = vsyncpa [#allocation9], 0 }
   0x6   :  { %26 = vsyncpa [#allocation12], 0  ;;  %s52_s25 = sshll.u32 %s2497_s5, 4  ;;  %s2200_s26 = smov [#allocation5]   ;;  %s53_s25 = int_to_ptr.hbm [resolvable:$true] %s52_s25 }
   0x7   :  { %s54_s27 = sshll.u32 %s2200_s26, 4  ;;  %s80_s30 = sshll.u32 %s2500_s8, 4  ;;  %s55_s27 = int_to_ptr.vmem [resolvable:$true] %s54_s27  ;;  %s81_s30 = int_to_ptr.hbm [resolvable:$true] %s80_s30 }
   0x8   :  { %s2201_s0 = smov 64   ;;  %s2202_s17 = smov 4  }
   0x9   :  { %60 = dma.hbm_to_vmem [thread:$0]  %s53_s25, 1024, %s55_s27, [#allocation6], %s2201_s0, %s2201_s0, %s2202_s17  }
   0xa   :  { %s2203_s15 = smov [#allocation8]   ;;  %s37_s5 = sshll.u32 %s2495_s3, 4  ;;  %s38_s5 = int_to_ptr.hbm [resolvable:$true] %s37_s5 }
   0xb   :  { %s82_s18 = sshll.u32 %s2203_s15, 4  ;;  %s67_s22 = sshll.u32 %s2499_s7, 4  ;;  %s83_s18 = int_to_ptr.vmem [resolvable:$true] %s82_s18  ;;  %s68_s22 = int_to_ptr.hbm [resolvable:$true] %s67_s22 }
   0xc   :  { %88 = dma.hbm_to_vmem [thread:$0]  %s81_s30, 2048, %s83_s18, [#allocation9], %s2201_s0, %s2201_s0, %s2202_s17  }
   0xd   :  { %s2204_s23 = smov [#allocation3]   ;;  %s2205_s25 = smov [#allocation7]  }
   0xe   :  { %s39_s24 = sshll.u32 %s2204_s23, 4  ;;  %s69_s3 = sshll.u32 %s2205_s25, 4  ;;  %s40_s24 = int_to_ptr.vmem [resolvable:$true] %s39_s24  ;;  %s70_s3 = int_to_ptr.vmem [resolvable:$true] %s69_s3 }
   0xf   :  { %45 = dma.hbm_to_vmem [thread:$0]  %s38_s5, 1024, %s40_s24, [#allocation4], %s2201_s0, %s2201_s0, %s2202_s17  }
  0x10   :  { %s95_s28 = sshll.u32 %s2502_s10, 4  ;;  %s110_s30 = sshll.u32 %s2504_s12, 4  ;;  %s96_s28 = int_to_ptr.hbm [resolvable:$true] %s95_s28  ;;  %s111_s30 = int_to_ptr.hbm [resolvable:$true] %s110_s30 }
  0x11   :  { %75 = dma.hbm_to_vmem [thread:$0]  %s68_s22, 2048, %s70_s3, [#allocation6], %s2201_s0, %s2201_s0, %s2202_s17  }
  0x12   :  { %s2206_s15 = smov [#allocation10]   ;;  %s2207_s19 = smov [#allocation11]  }
  0x13   :  { %s97_s18 = sshll.u32 %s2206_s15, 4  ;;  %s112_s10 = sshll.u32 %s2207_s19, 4  ;;  %s98_s18 = int_to_ptr.vmem [resolvable:$true] %s97_s18  ;;  %s113_s10 = int_to_ptr.vmem [resolvable:$true] %s112_s10 }
  0x14   :  { %103 = dma.hbm_to_vmem [thread:$0]  %s96_s28, 1024, %s98_s18, [#allocation9], %s2201_s0, %s2201_s0, %s2202_s17  }
  0x15   :  { %118 = dma.hbm_to_vmem [thread:$0]  %s111_s30, 1024, %s113_s10, [#allocation12], %s2201_s0, %s2201_s0, %s2202_s17  }
  0x16   :  { %2192 = dma.done.wait [#allocation4], 1024  }
  0x17   :  { %2193 = vsyncadd [#allocation4], 4294966272 }
  0x18   :  { %2194 = dma.done.wait [#allocation6], 3072  }
  0x19   :  { %2195 = vsyncadd [#allocation6], 4294964224 }
  0x1a   :  { %2196 = dma.done.wait [#allocation9], 3072  }
  0x1b   :  { %2197 = vsyncadd [#allocation9], 4294964224 }
  0x1c   :  { %2198 = dma.done.wait [#allocation12], 1024  }
  0x1d   :  { %2199 = vsyncadd [#allocation12], 4294966272  ;;  %v2208_v1 = vmov 0   ;;  %s2511_s5 = sld [smem:[#allocation17_spill]]  ;;  %v1954_v3 = vld [vmem:[#allocation3 + $0x38] sm:$0xff]  ;;  %v1953_v4 = vld [vmem:[#allocation3 + $0x30] sm:$0xff] }
  0x1e   :  { %2021 = vset.pattern.permute.xlu0 %v2208_v1  ;;  %244 = vmatpush.bf16.msra.mxu0 %v1954_v3  ;;  %v1952_v6 = vld [vmem:[#allocation3 + $0x28] sm:$0xff]  ;;  %v1951_v7 = vld [vmem:[#allocation3 + $0x20] sm:$0xff]  ;;  %v1950_v8 = vld [vmem:[#allocation3 + $0x18] sm:$0xff]  ;;  %vm454_vm4 = vcmask 64512   ;;  %vm1615_vm9 = vcmask 7168  }
  0x1f   :  { %v1949_v9 = vld [vmem:[#allocation3 + $0x10] sm:$0xff]  ;;  %v1948_v10 = vld [vmem:[#allocation3 + $0x8] sm:$0xff]  ;;  %v1947_v11 = vld [vmem:[#allocation3] sm:$0xff] }
  0x20   :  { %v1962_v12 = vld [vmem:[#allocation5 + $0x38] sm:$0xff]  ;;  %v1961_v13 = vld [vmem:[#allocation5 + $0x30] sm:$0xff]  ;;  %v1960_v14 = vld [vmem:[#allocation5 + $0x28] sm:$0xff] }
  0x21   :  { %329 = vmatpush.bf16.msra.mxu1 %v1962_v12  ;;  %v1959_v15 = vld [vmem:[#allocation5 + $0x20] sm:$0xff]  ;;  %v2022_v17 = vld [vmem:[%s2493_s1] ss:$0 sm:$0xff]  ;;  %v1957_v28 = vld [vmem:[#allocation5 + $0x10] sm:$0xff] }
  0x22   :  { %245 = vmatpush.bf16.msra.mxu0 %v1953_v4  ;;  %v2023_v18 = vld [vmem:[%s2494_s2] ss:$0 sm:$0xff]  ;;  %v1956_v29 = vld [vmem:[#allocation5 + $0x8] sm:$0xff]  ;;  %v1955_v30 = vld [vmem:[#allocation5] sm:$0xff] }
  0x23   :  { %v149_v2 = vld [vmem:[%s2511_s5] sm:$0xff]  ;;  %v150_v5 = vld [vmem:[%s2511_s5 + $0x8] sm:$0xff] }
  0x24   :  { %154 = vperm.xlu0 %2021, %v149_v2   ;;  %v1958_v27 = vld [vmem:[#allocation5 + $0x18] sm:$0xff] }
  0x25   :  { %330 = vmatpush.bf16.msra.mxu1 %v1961_v13  ;;  %v2024_v32 = vld [vmem:[%s2496_s4] ss:$0 sm:$0xff] }
  0x26   :  { %246 = vmatpush.bf16.msra.mxu0 %v1952_v6  ;;  %v2025_v39 = vld [vmem:[%s2498_s6] ss:$0 sm:$0xff] }
  0x29   :  { %331 = vmatpush.bf16.msra.mxu1 %v1960_v14 }
  0x2a   :  { %247 = vmatpush.bf16.msra.mxu0 %v1951_v7 }
  0x2c   :  { %159 = vperm.xlu0 %2021, %v150_v5  }
  0x2d   :  { %332 = vmatpush.bf16.msra.mxu1 %v1959_v15 }
  0x2e   :  { %248 = vmatpush.bf16.msra.mxu0 %v1950_v8 }
  0x31   :  { %333 = vmatpush.bf16.msra.mxu1 %v1958_v27 }
  0x32   :  { %249 = vmatpush.bf16.msra.mxu0 %v1949_v9 }
  0x35   :  { %334 = vmatpush.bf16.msra.mxu1 %v1957_v28 }
  0x36   :  { %250 = vmatpush.bf16.msra.mxu0 %v1948_v10 }
  0x39   :  { %335 = vmatpush.bf16.msra.mxu1 %v1956_v29 }
  0x3a   :  { %251 = vmatpush.bf16.msra.mxu0 %v1947_v11 }
  0x3d   :  { %336 = vmatpush.bf16.msra.mxu1 %v1955_v30 }
  0x96   :  { %v155_v16 = vpop.permute.xlu0 %154 }
  0x97   :  { %v165_v19 = vmul.f32 %v2022_v17, %v155_v16 }
  0x99   :  { %v171_v21 = vadd.f32 %v2023_v18, %v165_v19 }
  0x9b   :  { %v173_v24 = vmax.f32 %v171_v21, 0.0 }
  0x9e   :  { %v160_v20 = vpop.permute.xlu0 %159 }
  0x9f   :  { %v166_v22 = vmul.f32 %v2022_v17, %v160_v20 }
  0xa1   :  { %v172_v23 = vadd.f32 %v2023_v18, %v166_v22 }
  0xa3   :  { %v174_v25 = vmax.f32 %v172_v23, 0.0 }
  0xa5   :  { %v175_v26 = vpack.c.bf16 %v174_v25, %v173_v24 }
  0xa7   :  { %252 = vmatmul.bf16.vlgmr.msra.gmra.mxu0 %v175_v26 }
 0x124   :  { %v253_v31 = vpop.f32.mrf.mxu0 }
 0x125   :  { %v254_v33 = vadd.f32 %v2024_v32, %v253_v31 }
 0x127   :  { %v258_v36 = vmax.f32 %v254_v33, 0.0 }
 0x12c   :  { %v255_v34 = vpop.f32.mrf.mxu0 }
 0x12d   :  { %v256_v35 = vadd.f32 %v2024_v32, %v255_v34 }
 0x12f   :  { %v259_v37 = vmax.f32 %v256_v35, 0.0 }
 0x131   :  { %v260_v38 = vpack.c.bf16 %v259_v37, %v258_v36 }
 0x133   :  { %337 = vmatmul.bf16.vlgmr.msra.gmra.mxu1 %v260_v38 }
 0x1b0   :  { %v338_v40 = vpop.f32.mrf.mxu1 }
 0x1b1   :  { %v339_v41 = vadd.f32 %v2025_v39, %v338_v40 }
 0x1b3   :  { %v2351_v42 = vmax.f32 %v339_v41, 0.0 }
 0x1b5   :  { %v378_v43 = vmul.f32 %v2351_v42, %v2351_v42 }
 0x1b7   :  { %v380_v44 = vrot.slane %v378_v43, 4 }
 0x1b8   :  { %v340_v45 = vpop.f32.mrf.mxu1 }
 0x1b9   :  { %v381_v46 = vadd.f32 %v380_v44, %v378_v43  ;;  %v341_v47 = vadd.f32 %v2025_v39, %v340_v45 }
 0x1bb   :  { %v382_v48 = vrot.slane %v381_v46, 2  ;;  %v2355_v49 = vmax.f32 %v341_v47, 0.0 }
 0x1bd   :  { %v383_v50 = vadd.f32 %v382_v48, %v381_v46  ;;  %v379_v51 = vmul.f32 %v2355_v49, %v2355_v49  ;;  %v753_v52 = vpack.c.bf16 %v2355_v49, %v2351_v42 }
 0x1bf   :  { %v384_v53 = vrot.slane %v383_v50, 1  ;;  %v386_v54 = vrot.slane %v379_v51, 4 }
 0x1c1   :  { %v385_v55 = vadd.f32 %v384_v53, %v383_v50  ;;  %v387_v56 = vadd.f32 %v386_v54, %v379_v51 }
 0x1c3   :  { %2032 = vrsqrt.f32 %v385_v55  ;;  %v388_v57 = vrot.slane %v387_v56, 2  ;;  %vm399_vm0 = vcmp.eq.f32.partialorder %v385_v55, inf  ;;  %v402_v7 = vand.u32 2147483648, %v385_v55 }
 0x1c4   :  { %vm401_vm1 = vcmp.eq.f32.partialorder %v385_v55, 0.0 }
 0x1c5   :  { %v389_v58 = vadd.f32 %v388_v57, %v387_v56 }
 0x1c7   :  { %v390_v59 = vrot.slane %v389_v58, 1 }
 0x1c9   :  { %v2033_v60 = vpop.eup %2032  ;;  %v391_v61 = vadd.f32 %v390_v59, %v389_v58 }
 0x1ca   :  { %v393_v62 = vmul.f32 %v2033_v60, %v385_v55 }
 0x1cb   :  { %2034 = vrsqrt.f32 %v391_v61  ;;  %vm411_vm2 = vcmp.eq.f32.partialorder %v391_v61, inf  ;;  %v414_v15 = vand.u32 2147483648, %v391_v61  ;;  %vm413_vm3 = vcmp.eq.f32.partialorder %v391_v61, 0.0 }
 0x1cc   :  { %v394_v63 = vmul.f32 %v2033_v60, %v393_v62 }
 0x1ce   :  { %v395_v0 = vmul.f32 0.5, %v394_v63 }
 0x1d0   :  { %v396_v1 = vsub.f32 1.5, %v395_v0 }
 0x1d1   :  { %v2035_v2 = vpop.eup %2034 }
 0x1d2   :  { %v397_v3 = vmul.f32 %v2033_v60, %v396_v1  ;;  %v405_v4 = vmul.f32 %v2035_v2, %v391_v61 }
 0x1d4   :  { %v398_v5 = vmul.f32 %v397_v3, %v385_v55  ;;  %v406_v6 = vmul.f32 %v2035_v2, %v405_v4 }
 0x1d6   :  { %v400_v8 = vsel %vm399_vm0, %v385_v55, %v398_v5  ;;  %v407_v9 = vmul.f32 0.5, %v406_v6 }
 0x1d7   :  { %v403_v10 = vsel %vm401_vm1, %v402_v7, %v400_v8 }
 0x1d8   :  { %v416_v11 = vadd.f32 1e-06, %v403_v10  ;;  %v408_v12 = vsub.f32 1.5, %v407_v9 }
 0x1da   :  { %2036 = vrcp.f32 %v416_v11  ;;  %v409_v13 = vmul.f32 %v2035_v2, %v408_v12 }
 0x1dc   :  { %v410_v14 = vmul.f32 %v409_v13, %v391_v61 }
 0x1de   :  { %v412_v16 = vsel %vm411_vm2, %v391_v61, %v410_v14 }
 0x1df   :  { %v415_v17 = vsel %vm413_vm3, %v414_v15, %v412_v16 }
 0x1e0   :  { %v2037_v18 = vpop.eup %2036  ;;  %v417_v19 = vadd.f32 1e-06, %v415_v17 }
 0x1e1   :  { %v2362_v20 = vmul.f32 %v2037_v18, %v2351_v42 }
 0x1e2   :  { %2038 = vrcp.f32 %v417_v19 }
 0x1e3   :  { %422 = vxpose.xlu1.b32.start.end [1/1] (short) %v2362_v20, 128  ;;  %518 = vmatpush.msra.mxu2 %v2362_v20 }
 0x1e8   :  { %v2039_v21 = vpop.eup %2038 }
 0x1e9   :  { %v2367_v22 = vmul.f32 %v2039_v21, %v2355_v49 }
 0x1eb   :  { %663 = vmatpush.msra.mxu3 %v2367_v22 }
 0x263   :  { %568 = vxpose.xlu1.b32.start.end [1/1] (short) %v2367_v22, 128 }
 0x287   :  { %v438_v23 = vpop.trf.xlu1 }
 0x288   :  { %1690 = vmatmul.msk.f32.vlgmr.msra.gmra.mxu2 %vm454_vm4, %v438_v23 }
 0x28f   :  { %v439_v24 = vpop.trf.xlu1 }
 0x290   :  { %1691 = vmatmul.msk.f32.gmra.mxu2 %vm454_vm4, %v439_v24 }
 0x297   :  { %v440_v25 = vpop.trf.xlu1 }
 0x298   :  { %1692 = vmatmul.msk.f32.gmra.mxu2 %vm454_vm4, %v440_v25 }
 0x29f   :  { %v441_v26 = vpop.trf.xlu1 }
 0x2a0   :  { %1693 = vmatmul.msk.f32.gmra.mxu2 %vm454_vm4, %v441_v26 }
 0x2a7   :  { %v442_v27 = vpop.trf.xlu1 }
 0x2a8   :  { %1694 = vmatmul.msk.f32.gmra.mxu2 %vm454_vm4, %v442_v27 }
 0x2af   :  { %v443_v28 = vpop.trf.xlu1 }
 0x2b0   :  { %1695 = vmatmul.msk.f32.gmra.mxu2 %vm454_vm4, %v443_v28  ;;  %v1978_v28 = vld [vmem:[#allocation8 + $0x38] sm:$0xff] }
 0x2b7   :  { %v444_v29 = vpop.trf.xlu1 }
 0x2b8   :  { %1696 = vmatmul.msk.f32.gmra.mxu2 %vm454_vm4, %v444_v29  ;;  %v1969_v29 = vld [vmem:[#allocation7 + $0x30] sm:$0xff] }
 0x2bf   :  { %v445_v30 = vpop.trf.xlu1 }
 0x2c0   :  { %1697 = vmatmul.msk.f32.gmra.mxu2 %vm454_vm4, %v445_v30  ;;  %v1977_v30 = vld [vmem:[#allocation8 + $0x30] sm:$0xff] }
 0x2c7   :  { %v446_v31 = vpop.trf.xlu1 }
 0x2c8   :  { %1698 = vmatmul.msk.f32.gmra.mxu2 %vm454_vm4, %v446_v31  ;;  %v1968_v31 = vld [vmem:[#allocation7 + $0x28] sm:$0xff] }
 0x2cf   :  { %v447_v32 = vpop.trf.xlu1 }
 0x2d0   :  { %1699 = vmatmul.msk.f32.gmra.mxu2 %vm454_vm4, %v447_v32  ;;  %v1976_v32 = vld [vmem:[#allocation8 + $0x28] sm:$0xff] }
 0x2d7   :  { %v448_v33 = vpop.trf.xlu1 }
 0x2d8   :  { %1700 = vmatmul.msk.f32.gmra.mxu2 %vm454_vm4, %v448_v33  ;;  %v1967_v33 = vld [vmem:[#allocation7 + $0x20] sm:$0xff] }
 0x2df   :  { %v449_v34 = vpop.trf.xlu1 }
 0x2e0   :  { %1701 = vmatmul.msk.f32.gmra.mxu2 %vm454_vm4, %v449_v34  ;;  %v1975_v34 = vld [vmem:[#allocation8 + $0x20] sm:$0xff] }
 0x2e7   :  { %v450_v35 = vpop.trf.xlu1 }
 0x2e8   :  { %1702 = vmatmul.msk.f32.gmra.mxu2 %vm454_vm4, %v450_v35  ;;  %v1966_v35 = vld [vmem:[#allocation7 + $0x18] sm:$0xff] }
 0x2ef   :  { %v451_v36 = vpop.trf.xlu1 }
 0x2f0   :  { %1703 = vmatmul.msk.f32.gmra.mxu2 %vm454_vm4, %v451_v36  ;;  %v1974_v36 = vld [vmem:[#allocation8 + $0x18] sm:$0xff] }
 0x2f7   :  { %v452_v37 = vpop.trf.xlu1 }
 0x2f8   :  { %1704 = vmatmul.msk.f32.gmra.mxu2 %vm454_vm4, %v452_v37  ;;  %v1965_v37 = vld [vmem:[#allocation7 + $0x10] sm:$0xff] }
 0x2ff   :  { %v453_v38 = vpop.trf.xlu1 }
 0x300   :  { %1705 = vmatmul.msk.f32.gmra.mxu2 %vm454_vm4, %v453_v38  ;;  %v1964_v38 = vld [vmem:[#allocation7 + $0x8] sm:$0xff] }
 0x307   :  { %v584_v39 = vpop.trf.xlu1 }
 0x308   :  { %1706 = vmatmul.msk.f32.vlgmr.msra.gmra.mxu3 %vm454_vm4, %v584_v39  ;;  %v1972_v39 = vld [vmem:[#allocation8 + $0x8] sm:$0xff] }
 0x30b   :  { %v2388_v40 = vpop.f32.mrf.mxu2 }
 0x30f   :  { %v585_v41 = vpop.trf.xlu1 }
 0x310   :  { %1707 = vmatmul.msk.f32.gmra.mxu3 %vm454_vm4, %v585_v41  ;;  %v1971_v41 = vld [vmem:[#allocation8] sm:$0xff] }
 0x313   :  { %v523_v43 = vpop.f32.mrf.mxu2 }
 0x317   :  { %v586_v44 = vpop.trf.xlu1 }
 0x318   :  { %1708 = vmatmul.msk.f32.gmra.mxu3 %vm454_vm4, %v586_v44 }
 0x31b   :  { %v526_v45 = vpop.f32.mrf.mxu2 }
 0x31f   :  { %v587_v46 = vpop.trf.xlu1 }
 0x320   :  { %1709 = vmatmul.msk.f32.gmra.mxu3 %vm454_vm4, %v587_v46 }
 0x323   :  { %v529_v47 = vpop.f32.mrf.mxu2 }
 0x327   :  { %v588_v48 = vpop.trf.xlu1 }
 0x328   :  { %1710 = vmatmul.msk.f32.gmra.mxu3 %vm454_vm4, %v588_v48 }
 0x32b   :  { %v532_v50 = vpop.f32.mrf.mxu2 }
 0x32f   :  { %v589_v51 = vpop.trf.xlu1 }
 0x330   :  { %1711 = vmatmul.msk.f32.gmra.mxu3 %vm454_vm4, %v589_v51 }
 0x333   :  { %v535_v53 = vpop.f32.mrf.mxu2 }
 0x337   :  { %v590_v54 = vpop.trf.xlu1 }
 0x338   :  { %1712 = vmatmul.msk.f32.gmra.mxu3 %vm454_vm4, %v590_v54 }
 0x33b   :  { %v538_v55 = vpop.f32.mrf.mxu2 }
 0x33f   :  { %v591_v56 = vpop.trf.xlu1 }
 0x340   :  { %1713 = vmatmul.msk.f32.gmra.mxu3 %vm454_vm4, %v591_v56 }
 0x343   :  { %v541_v57 = vpop.f32.mrf.mxu2 }
 0x347   :  { %v592_v58 = vpop.trf.xlu1 }
 0x348   :  { %1714 = vmatmul.msk.f32.gmra.mxu3 %vm454_vm4, %v592_v58 }
 0x34b   :  { %v544_v59 = vpop.f32.mrf.mxu2 }
 0x34f   :  { %v593_v60 = vpop.trf.xlu1 }
 0x350   :  { %1715 = vmatmul.msk.f32.gmra.mxu3 %vm454_vm4, %v593_v60 }
 0x353   :  { %v547_v61 = vpop.f32.mrf.mxu2 }
 0x357   :  { %v594_v62 = vpop.trf.xlu1 }
 0x358   :  { %1716 = vmatmul.msk.f32.gmra.mxu3 %vm454_vm4, %v594_v62 }
 0x35b   :  { %v550_v63 = vpop.f32.mrf.mxu2 }
 0x35f   :  { %v595_v0 = vpop.trf.xlu1 }
 0x360   :  { %1717 = vmatmul.msk.f32.gmra.mxu3 %vm454_vm4, %v595_v0 }
 0x363   :  { %v553_v1 = vpop.f32.mrf.mxu2 }
 0x367   :  { %v596_v2 = vpop.trf.xlu1 }
 0x368   :  { %1718 = vmatmul.msk.f32.gmra.mxu3 %vm454_vm4, %v596_v2 }
 0x36b   :  { %v556_v3 = vpop.f32.mrf.mxu2 }
 0x36f   :  { %v597_v4 = vpop.trf.xlu1 }
 0x370   :  { %1719 = vmatmul.msk.f32.gmra.mxu3 %vm454_vm4, %v597_v4 }
 0x373   :  { %v559_v5 = vpop.f32.mrf.mxu2 }
 0x377   :  { %v598_v6 = vpop.trf.xlu1 }
 0x378   :  { %1720 = vmatmul.msk.f32.gmra.mxu3 %vm454_vm4, %v598_v6 }
 0x37b   :  { %v562_v7 = vpop.f32.mrf.mxu2 }
 0x37f   :  { %v599_v8 = vpop.trf.xlu1 }
 0x380   :  { %1721 = vmatmul.msk.f32.gmra.mxu3 %vm454_vm4, %v599_v8 }
 0x383   :  { %v565_v9 = vpop.f32.mrf.mxu2 }
 0x384   :  { %713 = vmatpush.msrb.mxu0 %v565_v9 }
 0x386   :  { %714 = vmatpush.msrb.mxu0 %v562_v7 }
 0x388   :  { %715 = vmatpush.msrb.mxu0 %v559_v5 }
 0x38a   :  { %716 = vmatpush.msrb.mxu0 %v556_v3 }
 0x38b   :  { %v665_v10 = vpop.f32.mrf.mxu3 }
 0x38c   :  { %717 = vmatpush.msrb.mxu0 %v553_v1 }
 0x38e   :  { %718 = vmatpush.msrb.mxu0 %v550_v63 }
 0x390   :  { %719 = vmatpush.msrb.mxu0 %v547_v61 }
 0x392   :  { %720 = vmatpush.msrb.mxu0 %v544_v59 }
 0x393   :  { %v668_v11 = vpop.f32.mrf.mxu3 }
 0x394   :  { %721 = vmatpush.msrb.mxu0 %v541_v57 }
 0x396   :  { %722 = vmatpush.msrb.mxu0 %v538_v55 }
 0x398   :  { %723 = vmatpush.msrb.mxu0 %v535_v53 }
 0x39a   :  { %724 = vmatpush.msrb.mxu0 %v532_v50 }
 0x39b   :  { %v671_v12 = vpop.f32.mrf.mxu3 }
 0x39c   :  { %725 = vmatpush.msrb.mxu0 %v529_v47  ;;  %v2026_v47 = vld [vmem:[%s2501_s9] ss:$0 sm:$0xff] }
 0x39e   :  { %726 = vmatpush.msrb.mxu0 %v526_v45 }
 0x3a0   :  { %727 = vmatpush.msrb.mxu0 %v523_v43 }
 0x3a2   :  { %728 = vmatpush.msrb.mxu0 %v2388_v40  ;;  %v1963_v40 = vld [vmem:[#allocation7] sm:$0xff] }
 0x3a3   :  { %v674_v13 = vpop.f32.mrf.mxu3  ;;  %729 = vmatmul.f32.vlgmr.msrb.gmra.mxu0 %v2362_v20  ;;  %v1970_v20 = vld [vmem:[#allocation7 + $0x38] sm:$0xff] }
 0x3a4   :  { %803 = vmatpush.bf16.msra.mxu0 %v1978_v28 }
 0x3a8   :  { %804 = vmatpush.bf16.msra.mxu0 %v1977_v30 }
 0x3ab   :  { %v677_v14 = vpop.f32.mrf.mxu3 }
 0x3ac   :  { %805 = vmatpush.bf16.msra.mxu0 %v1976_v32 }
 0x3b0   :  { %806 = vmatpush.bf16.msra.mxu0 %v1975_v34 }
 0x3b3   :  { %v680_v15 = vpop.f32.mrf.mxu3 }
 0x3b4   :  { %807 = vmatpush.bf16.msra.mxu0 %v1974_v36 }
 0x3bb   :  { %v683_v16 = vpop.f32.mrf.mxu3 }
 0x3c3   :  { %v686_v17 = vpop.f32.mrf.mxu3 }
 0x3cb   :  { %v689_v18 = vpop.f32.mrf.mxu3 }
 0x3d3   :  { %v692_v19 = vpop.f32.mrf.mxu3 }
 0x3db   :  { %v695_v21 = vpop.f32.mrf.mxu3 }
 0x3e3   :  { %v698_v23 = vpop.f32.mrf.mxu3 }
 0x3eb   :  { %v701_v24 = vpop.f32.mrf.mxu3 }
 0x3f3   :  { %v704_v25 = vpop.f32.mrf.mxu3 }
 0x3fb   :  { %v707_v26 = vpop.f32.mrf.mxu3 }
 0x403   :  { %v710_v27 = vpop.f32.mrf.mxu3 }
 0x404   :  { %733 = vmatpush.msrb.mxu1 %v710_v27 }
 0x406   :  { %734 = vmatpush.msrb.mxu1 %v707_v26 }
 0x408   :  { %735 = vmatpush.msrb.mxu1 %v704_v25 }
 0x40a   :  { %736 = vmatpush.msrb.mxu1 %v701_v24 }
 0x40c   :  { %737 = vmatpush.msrb.mxu1 %v698_v23 }
 0x40e   :  { %738 = vmatpush.msrb.mxu1 %v695_v21 }
 0x410   :  { %739 = vmatpush.msrb.mxu1 %v692_v19 }
 0x412   :  { %740 = vmatpush.msrb.mxu1 %v689_v18 }
 0x414   :  { %741 = vmatpush.msrb.mxu1 %v686_v17 }
 0x416   :  { %742 = vmatpush.msrb.mxu1 %v683_v16 }
 0x418   :  { %743 = vmatpush.msrb.mxu1 %v680_v15 }
 0x41a   :  { %744 = vmatpush.msrb.mxu1 %v677_v14 }
 0x41c   :  { %745 = vmatpush.msrb.mxu1 %v674_v13 }
 0x41e   :  { %746 = vmatpush.msrb.mxu1 %v671_v12 }
 0x420   :  { %747 = vmatpush.msrb.mxu1 %v668_v11  ;;  %v730_v43 = vpop.f32.mrf.mxu0 }
 0x422   :  { %748 = vmatpush.msrb.mxu1 %v665_v10 }
 0x423   :  { %749 = vmatmul.f32.vlgmr.msrb.gmra.mxu1 %v2367_v22  ;;  %v1973_v22 = vld [vmem:[#allocation8 + $0x10] sm:$0xff] }
 0x424   :  { %865 = vmatpush.bf16.msra.mxu1 %v1970_v20  ;;  %808 = vmatpush.bf16.msra.mxu0 %v1973_v22 }
 0x428   :  { %866 = vmatpush.bf16.msra.mxu1 %v1969_v29  ;;  %809 = vmatpush.bf16.msra.mxu0 %v1972_v39 }
 0x42c   :  { %867 = vmatpush.bf16.msra.mxu1 %v1968_v31  ;;  %810 = vmatpush.bf16.msra.mxu0 %v1971_v41 }
 0x430   :  { %868 = vmatpush.bf16.msra.mxu1 %v1967_v33 }
 0x434   :  { %869 = vmatpush.bf16.msra.mxu1 %v1966_v35 }
 0x438   :  { %870 = vmatpush.bf16.msra.mxu1 %v1965_v37 }
 0x43c   :  { %871 = vmatpush.bf16.msra.mxu1 %v1964_v38 }
 0x440   :  { %872 = vmatpush.bf16.msra.mxu1 %v1963_v40 }
 0x443   :  { %873 = vmatmul.bf16.vlgmr.msra.gmra.mxu1 %v753_v52 }
 0x4a0   :  { %v750_v44 = vpop.f32.mrf.mxu1 }
 0x4a1   :  { %v754_v45 = vpack.c.bf16 %v750_v44, %v730_v43 }
 0x4a3   :  { %811 = vmatmul.bf16.vlgmr.msra.gmra.mxu0 %v754_v45 }
 0x4c0   :  { %v874_v46 = vpop.f32.mrf.mxu1 }
 0x4c8   :  { %v876_v49 = vpop.f32.mrf.mxu1 }
 0x520   :  { %v812_v48 = vpop.f32.mrf.mxu0 }
 0x521   :  { %v875_v50 = vadd.f32 %v874_v46, %v812_v48 }
 0x523   :  { %v882_v51 = vadd.f32 %v2026_v47, %v875_v50 }
 0x525   :  { %v2414_v53 = vmax.f32 %v882_v51, 0.0 }
 0x527   :  { %v922_v42 = vmul.f32 %v2414_v53, %v2414_v53 }
 0x528   :  { %v814_v52 = vpop.f32.mrf.mxu0 }
 0x529   :  { %v924_v54 = vrot.slane %v922_v42, 4  ;;  %v877_v55 = vadd.f32 %v876_v49, %v814_v52 }
 0x52b   :  { %v925_v56 = vadd.f32 %v924_v54, %v922_v42  ;;  %v883_v57 = vadd.f32 %v2026_v47, %v877_v55 }
 0x52d   :  { %v926_v58 = vrot.slane %v925_v56, 2  ;;  %v2418_v59 = vmax.f32 %v883_v57, 0.0 }
 0x52f   :  { %v927_v60 = vadd.f32 %v926_v58, %v925_v56  ;;  %v923_v61 = vmul.f32 %v2418_v59, %v2418_v59  ;;  %v1296_v62 = vpack.c.bf16 %v2418_v59, %v2414_v53 }
 0x531   :  { %v928_v63 = vrot.slane %v927_v60, 1  ;;  %v930_v0 = vrot.slane %v923_v61, 4 }
 0x533   :  { %v929_v1 = vadd.f32 %v928_v63, %v927_v60  ;;  %v931_v2 = vadd.f32 %v930_v0, %v923_v61 }
 0x535   :  { %v932_v3 = vrot.slane %v931_v2, 2  ;;  %2040 = vrsqrt.f32 %v929_v1  ;;  %vm943_vm5 = vcmp.eq.f32.partialorder %v929_v1, inf  ;;  %v946_v17 = vand.u32 2147483648, %v929_v1 }
 0x536   :  { %vm945_vm6 = vcmp.eq.f32.partialorder %v929_v1, 0.0 }
 0x537   :  { %v933_v4 = vadd.f32 %v932_v3, %v931_v2 }
 0x539   :  { %v934_v5 = vrot.slane %v933_v4, 1 }
 0x53b   :  { %v2041_v6 = vpop.eup %2040  ;;  %v935_v7 = vadd.f32 %v934_v5, %v933_v4 }
 0x53c   :  { %v937_v8 = vmul.f32 %v2041_v6, %v929_v1 }
 0x53d   :  { %2042 = vrsqrt.f32 %v935_v7  ;;  %vm955_vm7 = vcmp.eq.f32.partialorder %v935_v7, inf  ;;  %v958_v27 = vand.u32 2147483648, %v935_v7  ;;  %vm957_vm8 = vcmp.eq.f32.partialorder %v935_v7, 0.0 }
 0x53e   :  { %v938_v9 = vmul.f32 %v2041_v6, %v937_v8 }
 0x540   :  { %v939_v10 = vmul.f32 0.5, %v938_v9 }
 0x542   :  { %v940_v11 = vsub.f32 1.5, %v939_v10 }
 0x543   :  { %v2043_v12 = vpop.eup %2042 }
 0x544   :  { %v941_v13 = vmul.f32 %v2041_v6, %v940_v11  ;;  %v949_v14 = vmul.f32 %v2043_v12, %v935_v7 }
 0x546   :  { %v942_v15 = vmul.f32 %v941_v13, %v929_v1  ;;  %v950_v16 = vmul.f32 %v2043_v12, %v949_v14 }
 0x548   :  { %v944_v18 = vsel %vm943_vm5, %v929_v1, %v942_v15  ;;  %v951_v19 = vmul.f32 0.5, %v950_v16 }
 0x549   :  { %v947_v21 = vsel %vm945_vm6, %v946_v17, %v944_v18 }
 0x54a   :  { %v960_v23 = vadd.f32 1e-06, %v947_v21  ;;  %v952_v24 = vsub.f32 1.5, %v951_v19 }
 0x54c   :  { %2044 = vrcp.f32 %v960_v23  ;;  %v953_v25 = vmul.f32 %v2043_v12, %v952_v24 }
 0x54e   :  { %v954_v26 = vmul.f32 %v953_v25, %v935_v7 }
 0x550   :  { %v956_v20 = vsel %vm955_vm7, %v935_v7, %v954_v26 }
 0x551   :  { %v959_v28 = vsel %vm957_vm8, %v958_v27, %v956_v20 }
 0x552   :  { %v2045_v29 = vpop.eup %2044  ;;  %v961_v30 = vadd.f32 1e-06, %v959_v28 }
 0x553   :  { %v2425_v31 = vmul.f32 %v2045_v29, %v2414_v53  ;;  %v1996_v53 = vld [vmem:[#allocation10 + $0x8] sm:$0xff] }
 0x554   :  { %2046 = vrcp.f32 %v961_v30 }
 0x555   :  { %966 = vxpose.xlu2.b32.start.end [1/1] (short) %v2425_v31, 128  ;;  %1061 = vmatpush.msrb.mxu0 %v2425_v31 }
 0x55a   :  { %v2047_v32 = vpop.eup %2046 }
 0x55b   :  { %v2430_v33 = vmul.f32 %v2047_v32, %v2418_v59  ;;  %v1995_v59 = vld [vmem:[#allocation10] sm:$0xff] }
 0x55d   :  { %1206 = vmatpush.msrb.mxu1 %v2430_v33 }
 0x5d5   :  { %1111 = vxpose.xlu2.b32.start.end [1/1] (short) %v2430_v33, 128 }
 0x5ee   :  { %v982_v34 = vpop.trf.xlu2 }
 0x5ef   :  { %1787 = vmatmul.msk.f32.vlgmr.msrb.gmra.mxu0 %vm454_vm4, %v982_v34 }
 0x5f6   :  { %v983_v35 = vpop.trf.xlu2 }
 0x5f7   :  { %1788 = vmatmul.msk.f32.gmra.mxu0 %vm454_vm4, %v983_v35 }
 0x5fe   :  { %v984_v36 = vpop.trf.xlu2 }
 0x5ff   :  { %1789 = vmatmul.msk.f32.gmra.mxu0 %vm454_vm4, %v984_v36 }
 0x606   :  { %v985_v37 = vpop.trf.xlu2 }
 0x607   :  { %1790 = vmatmul.msk.f32.gmra.mxu0 %vm454_vm4, %v985_v37 }
 0x60e   :  { %v986_v22 = vpop.trf.xlu2 }
 0x60f   :  { %1791 = vmatmul.msk.f32.gmra.mxu0 %vm454_vm4, %v986_v22 }
 0x616   :  { %v987_v38 = vpop.trf.xlu2 }
 0x617   :  { %1792 = vmatmul.msk.f32.gmra.mxu0 %vm454_vm4, %v987_v38  ;;  %v1994_v38 = vld [vmem:[#allocation8 + $0x78] sm:$0xff] }
 0x61e   :  { %v988_v39 = vpop.trf.xlu2 }
 0x61f   :  { %1793 = vmatmul.msk.f32.gmra.mxu0 %vm454_vm4, %v988_v39  ;;  %v1985_v39 = vld [vmem:[#allocation7 + $0x70] sm:$0xff] }
 0x626   :  { %v989_v40 = vpop.trf.xlu2 }
 0x627   :  { %1794 = vmatmul.msk.f32.gmra.mxu0 %vm454_vm4, %v989_v40  ;;  %v1993_v40 = vld [vmem:[#allocation8 + $0x70] sm:$0xff] }
 0x62e   :  { %v990_v41 = vpop.trf.xlu2 }
 0x62f   :  { %1795 = vmatmul.msk.f32.gmra.mxu0 %vm454_vm4, %v990_v41  ;;  %v1984_v41 = vld [vmem:[#allocation7 + $0x68] sm:$0xff] }
 0x636   :  { %v991_v43 = vpop.trf.xlu2 }
 0x637   :  { %1796 = vmatmul.msk.f32.gmra.mxu0 %vm454_vm4, %v991_v43  ;;  %v1992_v43 = vld [vmem:[#allocation8 + $0x68] sm:$0xff] }
 0x63e   :  { %v992_v44 = vpop.trf.xlu2 }
 0x63f   :  { %1797 = vmatmul.msk.f32.gmra.mxu0 %vm454_vm4, %v992_v44  ;;  %v1983_v44 = vld [vmem:[#allocation7 + $0x60] sm:$0xff] }
 0x646   :  { %v993_v45 = vpop.trf.xlu2 }
 0x647   :  { %1798 = vmatmul.msk.f32.gmra.mxu0 %vm454_vm4, %v993_v45  ;;  %v1991_v45 = vld [vmem:[#allocation8 + $0x60] sm:$0xff] }
 0x64e   :  { %v994_v46 = vpop.trf.xlu2 }
 0x64f   :  { %1799 = vmatmul.msk.f32.gmra.mxu0 %vm454_vm4, %v994_v46  ;;  %v1982_v46 = vld [vmem:[#allocation7 + $0x58] sm:$0xff] }
 0x656   :  { %v995_v47 = vpop.trf.xlu2 }
 0x657   :  { %1800 = vmatmul.msk.f32.gmra.mxu0 %vm454_vm4, %v995_v47  ;;  %v1990_v47 = vld [vmem:[#allocation8 + $0x58] sm:$0xff] }
 0x65e   :  { %v996_v48 = vpop.trf.xlu2 }
 0x65f   :  { %1801 = vmatmul.msk.f32.gmra.mxu0 %vm454_vm4, %v996_v48  ;;  %v1981_v48 = vld [vmem:[#allocation7 + $0x50] sm:$0xff] }
 0x666   :  { %v997_v50 = vpop.trf.xlu2 }
 0x667   :  { %1802 = vmatmul.msk.f32.gmra.mxu0 %vm454_vm4, %v997_v50  ;;  %v1980_v50 = vld [vmem:[#allocation7 + $0x48] sm:$0xff] }
 0x66c   :  { %v2450_v51 = vpop.f32.mrf.mxu0 }
 0x66e   :  { %v1127_v42 = vpop.trf.xlu2 }
 0x66f   :  { %1803 = vmatmul.msk.f32.vlgmr.msrb.gmra.mxu1 %vm454_vm4, %v1127_v42  ;;  %v1979_v42 = vld [vmem:[#allocation7 + $0x40] sm:$0xff] }
 0x674   :  { %v1066_v49 = vpop.f32.mrf.mxu0 }
 0x676   :  { %v1128_v52 = vpop.trf.xlu2 }
 0x677   :  { %1804 = vmatmul.msk.f32.gmra.mxu1 %vm454_vm4, %v1128_v52 }
 0x67c   :  { %v1069_v54 = vpop.f32.mrf.mxu0 }
 0x67e   :  { %v1129_v55 = vpop.trf.xlu2 }
 0x67f   :  { %1805 = vmatmul.msk.f32.gmra.mxu1 %vm454_vm4, %v1129_v55 }
 0x684   :  { %v1072_v56 = vpop.f32.mrf.mxu0 }
 0x686   :  { %v1130_v57 = vpop.trf.xlu2 }
 0x687   :  { %1806 = vmatmul.msk.f32.gmra.mxu1 %vm454_vm4, %v1130_v57  ;;  %v2001_v57 = vld [vmem:[#allocation10 + $0x30] sm:$0xff] }
 0x68c   :  { %v1075_v58 = vpop.f32.mrf.mxu0 }
 0x68e   :  { %v1131_v60 = vpop.trf.xlu2 }
 0x68f   :  { %1807 = vmatmul.msk.f32.gmra.mxu1 %vm454_vm4, %v1131_v60  ;;  %v1999_v60 = vld [vmem:[#allocation10 + $0x20] sm:$0xff] }
 0x694   :  { %v1078_v61 = vpop.f32.mrf.mxu0 }
 0x696   :  { %v1132_v63 = vpop.trf.xlu2 }
 0x697   :  { %1808 = vmatmul.msk.f32.gmra.mxu1 %vm454_vm4, %v1132_v63  ;;  %v1997_v63 = vld [vmem:[#allocation10 + $0x10] sm:$0xff] }
 0x69c   :  { %v1081_v0 = vpop.f32.mrf.mxu0 }
 0x69e   :  { %v1133_v1 = vpop.trf.xlu2 }
 0x69f   :  { %1809 = vmatmul.msk.f32.gmra.mxu1 %vm454_vm4, %v1133_v1  ;;  %v2008_v1 = vld [vmem:[#allocation11 + $0x28] sm:$0xff] }
 0x6a4   :  { %v1084_v2 = vpop.f32.mrf.mxu0 }
 0x6a6   :  { %v1134_v3 = vpop.trf.xlu2 }
 0x6a7   :  { %1810 = vmatmul.msk.f32.gmra.mxu1 %vm454_vm4, %v1134_v3 }
 0x6ac   :  { %v1087_v4 = vpop.f32.mrf.mxu0 }
 0x6ae   :  { %v1135_v5 = vpop.trf.xlu2 }
 0x6af   :  { %1811 = vmatmul.msk.f32.gmra.mxu1 %vm454_vm4, %v1135_v5 }
 0x6b4   :  { %v1090_v6 = vpop.f32.mrf.mxu0 }
 0x6b6   :  { %v1136_v7 = vpop.trf.xlu2 }
 0x6b7   :  { %1812 = vmatmul.msk.f32.gmra.mxu1 %vm454_vm4, %v1136_v7 }
 0x6bc   :  { %v1093_v8 = vpop.f32.mrf.mxu0 }
 0x6be   :  { %v1137_v9 = vpop.trf.xlu2 }
 0x6bf   :  { %1813 = vmatmul.msk.f32.gmra.mxu1 %vm454_vm4, %v1137_v9 }
 0x6c4   :  { %v1096_v10 = vpop.f32.mrf.mxu0 }
 0x6c6   :  { %v1138_v11 = vpop.trf.xlu2 }
 0x6c7   :  { %1814 = vmatmul.msk.f32.gmra.mxu1 %vm454_vm4, %v1138_v11 }
 0x6cc   :  { %v1099_v12 = vpop.f32.mrf.mxu0 }
 0x6ce   :  { %v1139_v13 = vpop.trf.xlu2 }
 0x6cf   :  { %1815 = vmatmul.msk.f32.gmra.mxu1 %vm454_vm4, %v1139_v13 }
 0x6d4   :  { %v1102_v14 = vpop.f32.mrf.mxu0 }
 0x6d6   :  { %v1140_v15 = vpop.trf.xlu2 }
 0x6d7   :  { %1816 = vmatmul.msk.f32.gmra.mxu1 %vm454_vm4, %v1140_v15  ;;  %v2006_v15 = vld [vmem:[#allocation11 + $0x18] sm:$0xff] }
 0x6dc   :  { %v1105_v16 = vpop.f32.mrf.mxu0 }
 0x6de   :  { %v1141_v17 = vpop.trf.xlu2 }
 0x6df   :  { %1817 = vmatmul.msk.f32.gmra.mxu1 %vm454_vm4, %v1141_v17  ;;  %v2004_v17 = vld [vmem:[#allocation11 + $0x8] sm:$0xff] }
 0x6e4   :  { %v1108_v18 = vpop.f32.mrf.mxu0 }
 0x6e5   :  { %1256 = vmatpush.msrb.mxu2 %v1108_v18  ;;  %v2003_v18 = vld [vmem:[#allocation11] sm:$0xff] }
 0x6e6   :  { %v1142_v19 = vpop.trf.xlu2 }
 0x6e7   :  { %1818 = vmatmul.msk.f32.gmra.mxu1 %vm454_vm4, %v1142_v19  ;;  %1257 = vmatpush.msrb.mxu2 %v1105_v16  ;;  %v2005_v16 = vld [vmem:[#allocation11 + $0x10] sm:$0xff] }
 0x6e9   :  { %1258 = vmatpush.msrb.mxu2 %v1102_v14 }
 0x6eb   :  { %1259 = vmatpush.msrb.mxu2 %v1099_v12 }
 0x6ec   :  { %v1208_v21 = vpop.f32.mrf.mxu1 }
 0x6ed   :  { %1260 = vmatpush.msrb.mxu2 %v1096_v10 }
 0x6ef   :  { %1261 = vmatpush.msrb.mxu2 %v1093_v8 }
 0x6f1   :  { %1262 = vmatpush.msrb.mxu2 %v1090_v6  ;;  %v2027_v6 = vld [vmem:[%s2501_s9 + $0x1] ss:$0 sm:$0xff] }
 0x6f3   :  { %1263 = vmatpush.msrb.mxu2 %v1087_v4 }
 0x6f4   :  { %v1211_v23 = vpop.f32.mrf.mxu1 }
 0x6f5   :  { %1264 = vmatpush.msrb.mxu2 %v1084_v2  ;;  %v2007_v2 = vld [vmem:[#allocation11 + $0x20] sm:$0xff] }
 0x6f7   :  { %1265 = vmatpush.msrb.mxu2 %v1081_v0  ;;  %v2009_v0 = vld [vmem:[#allocation11 + $0x30] sm:$0xff] }
 0x6f9   :  { %1266 = vmatpush.msrb.mxu2 %v1078_v61  ;;  %v1998_v61 = vld [vmem:[#allocation10 + $0x18] sm:$0xff] }
 0x6fb   :  { %1267 = vmatpush.msrb.mxu2 %v1075_v58  ;;  %v2000_v58 = vld [vmem:[#allocation10 + $0x28] sm:$0xff] }
 0x6fc   :  { %v1214_v24 = vpop.f32.mrf.mxu1 }
 0x6fd   :  { %1268 = vmatpush.msrb.mxu2 %v1072_v56  ;;  %v2002_v56 = vld [vmem:[#allocation10 + $0x38] sm:$0xff] }
 0x6ff   :  { %1269 = vmatpush.msrb.mxu2 %v1069_v54 }
 0x701   :  { %1270 = vmatpush.msrb.mxu2 %v1066_v49  ;;  %v1987_v49 = vld [vmem:[#allocation8 + $0x40] sm:$0xff] }
 0x703   :  { %1271 = vmatpush.msrb.mxu2 %v2450_v51  ;;  %v1988_v51 = vld [vmem:[#allocation8 + $0x48] sm:$0xff] }
 0x704   :  { %v1217_v25 = vpop.f32.mrf.mxu1  ;;  %1272 = vmatmul.f32.vlgmr.msrb.gmra.mxu2 %v2425_v31  ;;  %v1986_v31 = vld [vmem:[#allocation7 + $0x78] sm:$0xff] }
 0x705   :  { %1346 = vmatpush.bf16.msra.mxu2 %v1994_v38  ;;  %v2031_v38 = vld [vmem:[#allocation2] ss:$0 sm:$0xff] }
 0x709   :  { %1347 = vmatpush.bf16.msra.mxu2 %v1993_v40 }
 0x70c   :  { %v1220_v26 = vpop.f32.mrf.mxu1 }
 0x70d   :  { %1348 = vmatpush.bf16.msra.mxu2 %v1992_v43 }
 0x711   :  { %1349 = vmatpush.bf16.msra.mxu2 %v1991_v45 }
 0x714   :  { %v1223_v27 = vpop.f32.mrf.mxu1 }
 0x715   :  { %1350 = vmatpush.bf16.msra.mxu2 %v1990_v47 }
 0x71c   :  { %v1226_v20 = vpop.f32.mrf.mxu1 }
 0x724   :  { %v1229_v28 = vpop.f32.mrf.mxu1 }
 0x72c   :  { %v1232_v29 = vpop.f32.mrf.mxu1 }
 0x734   :  { %v1235_v30 = vpop.f32.mrf.mxu1 }
 0x73c   :  { %v1238_v32 = vpop.f32.mrf.mxu1 }
 0x744   :  { %v1241_v34 = vpop.f32.mrf.mxu1 }
 0x74c   :  { %v1244_v35 = vpop.f32.mrf.mxu1 }
 0x754   :  { %v1247_v36 = vpop.f32.mrf.mxu1 }
 0x75c   :  { %v1250_v37 = vpop.f32.mrf.mxu1 }
 0x764   :  { %v1253_v22 = vpop.f32.mrf.mxu1 }
 0x765   :  { %1276 = vmatpush.msrb.mxu3 %v1253_v22 }
 0x767   :  { %1277 = vmatpush.msrb.mxu3 %v1250_v37 }
 0x769   :  { %1278 = vmatpush.msrb.mxu3 %v1247_v36 }
 0x76b   :  { %1279 = vmatpush.msrb.mxu3 %v1244_v35 }
 0x76d   :  { %1280 = vmatpush.msrb.mxu3 %v1241_v34 }
 0x76f   :  { %1281 = vmatpush.msrb.mxu3 %v1238_v32  ;;  %v2030_v32 = vld [vmem:[%s2506_s14] ss:$0 sm:$0xff] }
 0x771   :  { %1282 = vmatpush.msrb.mxu3 %v1235_v30 }
 0x773   :  { %1283 = vmatpush.msrb.mxu3 %v1232_v29 }
 0x775   :  { %1284 = vmatpush.msrb.mxu3 %v1229_v28  ;;  %v2029_v28 = vld [vmem:[%s2505_s13] ss:$0 sm:$0xff] }
 0x777   :  { %1285 = vmatpush.msrb.mxu3 %v1226_v20 }
 0x779   :  { %1286 = vmatpush.msrb.mxu3 %v1223_v27 }
 0x77b   :  { %1287 = vmatpush.msrb.mxu3 %v1220_v26 }
 0x77d   :  { %1288 = vmatpush.msrb.mxu3 %v1217_v25 }
 0x77f   :  { %1289 = vmatpush.msrb.mxu3 %v1214_v24 }
 0x781   :  { %1290 = vmatpush.msrb.mxu3 %v1211_v23 }
 0x783   :  { %1291 = vmatpush.msrb.mxu3 %v1208_v21  ;;  %v2028_v21 = vld [vmem:[%s2503_s11] ss:$0 sm:$0xff] }
 0x784   :  { %1292 = vmatmul.f32.vlgmr.msrb.gmra.mxu3 %v2430_v33  ;;  %v1989_v33 = vld [vmem:[#allocation8 + $0x50] sm:$0xff] }
 0x785   :  { %1408 = vmatpush.bf16.msra.mxu3 %v1986_v31  ;;  %1351 = vmatpush.bf16.msra.mxu2 %v1989_v33 }
 0x787   :  { %v1273_v52 = vpop.f32.mrf.mxu2 }
 0x789   :  { %1409 = vmatpush.bf16.msra.mxu3 %v1985_v39  ;;  %1352 = vmatpush.bf16.msra.mxu2 %v1988_v51 }
 0x78d   :  { %1410 = vmatpush.bf16.msra.mxu3 %v1984_v41  ;;  %1353 = vmatpush.bf16.msra.mxu2 %v1987_v49 }
 0x791   :  { %1411 = vmatpush.bf16.msra.mxu3 %v1983_v44  ;;  %1498 = vmatpush.bf16.msrb.mxu2 %v2002_v56 }
 0x795   :  { %1412 = vmatpush.bf16.msra.mxu3 %v1982_v46  ;;  %1499 = vmatpush.bf16.msrb.mxu2 %v2001_v57 }
 0x799   :  { %1413 = vmatpush.bf16.msra.mxu3 %v1981_v48  ;;  %1500 = vmatpush.bf16.msrb.mxu2 %v2000_v58 }
 0x79d   :  { %1414 = vmatpush.bf16.msra.mxu3 %v1980_v50  ;;  %1501 = vmatpush.bf16.msrb.mxu2 %v1999_v60 }
 0x7a1   :  { %1415 = vmatpush.bf16.msra.mxu3 %v1979_v42  ;;  %1502 = vmatpush.bf16.msrb.mxu2 %v1998_v61 }
 0x7a4   :  { %1416 = vmatmul.bf16.vlgmr.msra.gmra.mxu3 %v1296_v62  ;;  %v2010_v62 = vld [vmem:[#allocation11 + $0x38] sm:$0xff] }
 0x7a5   :  { %1503 = vmatpush.bf16.msrb.mxu2 %v1997_v63  ;;  %1583 = vmatpush.bf16.msrb.mxu3 %v2010_v62 }
 0x7a9   :  { %1504 = vmatpush.bf16.msrb.mxu2 %v1996_v53  ;;  %1584 = vmatpush.bf16.msrb.mxu3 %v2009_v0 }
 0x7ad   :  { %1505 = vmatpush.bf16.msrb.mxu2 %v1995_v59  ;;  %1585 = vmatpush.bf16.msrb.mxu3 %v2008_v1 }
 0x7b1   :  { %1586 = vmatpush.bf16.msrb.mxu3 %v2007_v2 }
 0x7b5   :  { %1587 = vmatpush.bf16.msrb.mxu3 %v2006_v15 }
 0x7b9   :  { %1588 = vmatpush.bf16.msrb.mxu3 %v2005_v16 }
 0x7bd   :  { %1589 = vmatpush.bf16.msrb.mxu3 %v2004_v17 }
 0x7c1   :  { %1590 = vmatpush.bf16.msrb.mxu3 %v2003_v18 }
 0x807   :  { %v1293_v54 = vpop.f32.mrf.mxu3 }
 0x808   :  { %v1297_v55 = vpack.c.bf16 %v1293_v54, %v1273_v52 }
 0x80a   :  { %1354 = vmatmul.bf16.vlgmr.msra.gmra.mxu2 %v1297_v55 }
 0x827   :  { %v1417_v3 = vpop.f32.mrf.mxu3 }
 0x82f   :  { %v1419_v7 = vpop.f32.mrf.mxu3 }
 0x88d   :  { %v1355_v4 = vpop.f32.mrf.mxu2 }
 0x88e   :  { %v1418_v5 = vadd.f32 %v1417_v3, %v1355_v4 }
 0x890   :  { %v1425_v9 = vadd.f32 %v2027_v6, %v1418_v5 }
 0x892   :  { %v1427_v12 = vmax.f32 %v1425_v9, 0.0 }
 0x895   :  { %v1357_v8 = vpop.f32.mrf.mxu2 }
 0x896   :  { %v1420_v10 = vadd.f32 %v1419_v7, %v1357_v8 }
 0x898   :  { %v1426_v11 = vadd.f32 %v2027_v6, %v1420_v10 }
 0x89a   :  { %v1428_v13 = vmax.f32 %v1426_v11, 0.0 }
 0x89c   :  { %v1429_v14 = vpack.c.bf16 %v1428_v13, %v1427_v12 }
 0x89e   :  { %1506 = vmatmul.bf16.vlgmr.msrb.gmra.mxu2 %v1429_v14 }
 0x921   :  { %v1507_v19 = vpop.f32.mrf.mxu2 }
 0x922   :  { %v1508_v23 = vadd.f32 %v2028_v21, %v1507_v19 }
 0x924   :  { %v1512_v26 = vmax.f32 %v1508_v23, 0.0 }
 0x929   :  { %v1509_v24 = vpop.f32.mrf.mxu2 }
 0x92a   :  { %v1510_v25 = vadd.f32 %v2028_v21, %v1509_v24 }
 0x92c   :  { %v1513_v27 = vmax.f32 %v1510_v25, 0.0 }
 0x92e   :  { %v1514_v20 = vpack.c.bf16 %v1513_v27, %v1512_v26 }
 0x930   :  { %1591 = vmatmul.bf16.vlgmr.msrb.gmra.mxu3 %v1514_v20 }
 0x9b3   :  { %v1592_v29 = vpop.f32.mrf.mxu3 }
 0x9b4   :  { %v1593_v30 = vadd.f32 %v2029_v28, %v1592_v29 }
 0x9b6   :  { %v1597_v34 = vmax.f32 %v1593_v30, 0.0 }
 0x9b8   :  { %v1603_v35 = vmul.f32 %v2030_v32, %v1597_v34 }
 0x9ba   :  { %1605 = vadd.xlane.f32.xlu0 %v1603_v35 }
 0x9bb   :  { %v1594_v36 = vpop.f32.mrf.mxu3 }
 0x9bc   :  { %v1595_v37 = vadd.f32 %v2029_v28, %v1594_v36 }
 0x9be   :  { %v1598_v22 = vmax.f32 %v1595_v37, 0.0 }
 0x9c0   :  { %v1604_v31 = vmul.f32 %v2030_v32, %v1598_v22 }
 0x9c2   :  { %1607 = vadd.xlane.f32.xlu0 %v1604_v31 }
 0xa2d   :  { %v1606_v39 = vpop.xlane.xlu0 %1605 }
 0xa2e   :  { %v1613_v40 = vadd.f32 %v2031_v38, %v1606_v39 }
 0xa30   :  { %1616 = vst.msk [vmem:[%s2508_s16] sm:$0xff] %vm1615_vm9, %v1613_v40 }
 0xa35   :  { %v1608_v41 = vpop.xlane.xlu0 %1607 }
 0xa36   :  { %v1614_v43 = vadd.f32 %v2031_v38, %v1608_v41 }
 0xa38   :  { %1617 = vst.msk [vmem:[%s2508_s16 + $0x8] sm:$0xff] %vm1615_vm9, %v1614_v43 }
 0xa39   :  { %1622 = vsyncpa [#allocation4], 1 }
 0xa3a   :  { %1623 = vsyncpa [#allocation6], 1 }
 0xa3b   :  { %1624 = vsyncpa [#allocation9], 1 }
 0xa3c   :  { %1625 = vsyncpa [#allocation12], 1 }

</bundles_post_ra>
